<compile_context>
chip_gen: v7x
topology: tpu7x:2x2x1
jax: 0.10.0
libtpu: 0.0.40
codegen_flags: <defaults>
</compile_context>

<pallas_src>
import jax
import jax.numpy as jnp
from jax.experimental import pallas as pl
from jax.experimental.pallas import tpu as pltpu


def _expand_conv_weight(w_hwio, width):
    """Fold kW taps + Cin into a lane-folded weight matrix per dy.

    w_hwio: (3, 3, Cin, Cout)  ->  E: (3, width*Cin, width*Cout) with
      E[dy, w_in*Cin+ci, w*Cout+co] = w_hwio[dy, w_in - w + 1, ci, co]
    when the tap index (w_in - w + 1) is in [0, 3), else 0.  The zero entries
    also realize the W zero-padding of the conv.
    """
    kH, kW, cin, cout = w_hwio.shape
    j = jnp.arange(width * cin)
    k = jnp.arange(width * cout)
    w_in, ci = j // cin, j % cin
    w_out, co = k // cout, k % cout
    dx = w_in[:, None] - w_out[None, :] + 1          # (J, K) tap index along W
    valid = (dx >= 0) & (dx < kW)
    dxc = jnp.clip(dx, 0, kW - 1)
    e = w_hwio[:, dxc, ci[:, None], co[None, :]]     # (3, J, K)
    return jnp.where(valid[None, :, :], e, 0.0).astype(jnp.float32)


def _pooling_matrices(H, W, cout, scale):
    """0/1 matrices so AvgPool2d(scale) == (1/scale^2) * PhT @ act @ Pw."""
    Ho, Wo = H // scale, W // scale
    h = jnp.arange(H)
    ho = jnp.arange(Ho)
    pht = (h[None, :] // scale == ho[:, None]).astype(jnp.float32)    # (Ho, H)
    k_in = jnp.arange(W * cout)
    k_out = jnp.arange(Wo * cout)
    w_in, c_in = k_in // cout, k_in % cout
    w_out, c_out = k_out // cout, k_out % cout
    pw = ((w_in[:, None] // scale == w_out[None, :])
          & (c_in[:, None] == c_out[None, :])).astype(jnp.float32)    # (W*C, Wo*C)
    return pht, pw


def init_conv_block_params(key, in_channels, out_channels):
    """Deterministic params for the 3 conv layers (PyTorch OIHW -> HWIO)."""
    params = []
    cin = in_channels
    for _ in range(3):
        key, kw, kb = jax.random.split(key, 3)
        w_oihw = 0.1 * jax.random.normal(kw, (out_channels, cin, 3, 3), jnp.float32)
        b = 0.1 * jax.random.normal(kb, (out_channels,), jnp.float32)
        params.append((jnp.transpose(w_oihw, (2, 3, 1, 0)), b))   # (kH,kW,Cin,Cout)
        cin = out_channels
    return params


def conv_block_forward(x_nchw, params, *, down=False, downscale=2):
    """Forward pass matching ConvBlock.forward (batch_norm=False)."""
    B, Cin, H, W = x_nchw.shape
    Cout = params[0][0].shape[3]
    N = W * Cout

    # NCHW -> lane-dense (B, H, W*Cin)   (layout glue only; reshape is free).
    x2d = jnp.transpose(x_nchw, (0, 2, 3, 1)).reshape(B, H, W * Cin)

    e_mats, b_rows = [], []
    for (w_hwio, b) in params:
        e_mats.append(_expand_conv_weight(w_hwio, W))                    # (3, W*cin, N)
        b_rows.append(jnp.tile(b, W).reshape(1, N).astype(jnp.float32))  # bias per lane

    if down:
        Ho, Wo = H // downscale, W // downscale
        pht, pw = _pooling_matrices(H, W, Cout, downscale)
        out_h, out_lanes = Ho, Wo * Cout
    else:
        Ho, Wo = H, W
        out_h, out_lanes = H, N

    def kernel(x_ref, e1, b1, e2, b2, e3, b3, *rest):
        if down:
            pht_ref, pw_ref, o_ref, buf0, buf1, buf2 = rest
        else:
            o_ref, buf0, buf1, buf2 = rest

        def conv_layer(src, e_ref, b_ref):
            acc = jnp.zeros((H, N), jnp.float32)
            for dy in range(3):                      # static unroll: 3 MXU matmuls
                acc = acc + jnp.dot(src[dy:dy + H, :], e_ref[dy],
                                    preferred_element_type=jnp.float32)
            acc = acc + b_ref[...]                   # lane-broadcast bias
            return jnp.where(acc >= 0.0, acc, 0.2 * acc)   # LeakyReLU(0.2)

        # Zero the padded buffers (tiny); interiors are overwritten below.
        buf0[...] = jnp.zeros_like(buf0)
        buf1[...] = jnp.zeros_like(buf1)
        buf2[...] = jnp.zeros_like(buf2)

        buf0[1:H + 1, :] = x_ref[...]                # in-kernel H zero-padding
        a1 = conv_layer(buf0, e1, b1)
        buf1[1:H + 1, :] = a1                        # stays in VMEM
        a2 = conv_layer(buf1, e2, b2)
        buf2[1:H + 1, :] = a2                        # stays in VMEM
        a3 = conv_layer(buf2, e3, b3)                # (H, W*Cout) f32

        if down:
            pooled = jnp.dot(pht_ref[...], a3, preferred_element_type=jnp.float32)
            pooled = jnp.dot(pooled, pw_ref[...], preferred_element_type=jnp.float32)
            o_ref[...] = (pooled * (1.0 / (downscale * downscale))).astype(o_ref.dtype)
        else:
            o_ref[...] = a3.astype(o_ref.dtype)      # unmasked 128-lane store

    in_arrays = [x2d, e_mats[0], b_rows[0], e_mats[1], b_rows[1], e_mats[2], b_rows[2]]
    in_specs = [
        pl.BlockSpec((None, H, W * Cin), lambda bi: (bi, 0, 0)),
        pl.BlockSpec(e_mats[0].shape, lambda bi: (0, 0, 0)),
        pl.BlockSpec((1, N), lambda bi: (0, 0)),
        pl.BlockSpec(e_mats[1].shape, lambda bi: (0, 0, 0)),
        pl.BlockSpec((1, N), lambda bi: (0, 0)),
        pl.BlockSpec(e_mats[2].shape, lambda bi: (0, 0, 0)),
        pl.BlockSpec((1, N), lambda bi: (0, 0)),
    ]
    if down:
        in_arrays += [pht, pw]
        in_specs += [
            pl.BlockSpec(pht.shape, lambda bi: (0, 0)),
            pl.BlockSpec(pw.shape, lambda bi: (0, 0)),
        ]

    out2d = pl.pallas_call(
        kernel,
        out_shape=jax.ShapeDtypeStruct((B, out_h, out_lanes), x_nchw.dtype),
        grid=(B,),
        in_specs=in_specs,
        out_specs=pl.BlockSpec((None, out_h, out_lanes), lambda bi: (bi, 0, 0)),
        scratch_shapes=[
            pltpu.VMEM((H + 2, W * Cin), jnp.float32),   # padded input
            pltpu.VMEM((H + 2, N), jnp.float32),         # padded layer-1 act
            pltpu.VMEM((H + 2, N), jnp.float32),         # padded layer-2 act
        ],
        compiler_params=pltpu.CompilerParams(
            dimension_semantics=("parallel",)),
    )(*in_arrays)

    # (B, Ho, Wo*Cout) -> NHWC -> NCHW (matches PyTorch output convention).
    out_nhwc = out2d.reshape(B, Ho, Wo, Cout)
    return jnp.transpose(out_nhwc, (0, 3, 1, 2))


if __name__ == "__main__":
    key = jax.random.PRNGKey(0)
    key, kx = jax.random.split(key)

    B, Cin, H, W = 2, 4, 16, 16
    Cout = 8
    x = jax.random.normal(kx, (B, Cin, H, W), jnp.float32)
    params = init_conv_block_params(key, Cin, Cout)

    # Default ConvBlock config: batch_norm=False, down=False.
    out = conv_block_forward(x, params, down=False)
    out = jax.block_until_ready(out)
    assert out.shape == (B, Cout, H, W), out.shape

    # Also exercise the fused avg-pool epilogue (down=True, downscale=2).
    out_d = conv_block_forward(x, params, down=True, downscale=2)
    out_d = jax.block_until_ready(out_d)
    assert out_d.shape == (B, Cout, H // 2, W // 2), out_d.shape

    print("KERNEL_OK")
</pallas_src>

<mosaic_0001>
module attributes {stable_mosaic.version = 11 : i64} {
  func.func @kernel(%arg0: i32, %arg1: memref<1x16x64xf32, #tpu.memory_space<vmem>>, %arg2: memref<3x64x128xf32, #tpu.memory_space<vmem>>, %arg3: memref<1x128xf32, #tpu.memory_space<vmem>>, %arg4: memref<3x128x128xf32, #tpu.memory_space<vmem>>, %arg5: memref<1x128xf32, #tpu.memory_space<vmem>>, %arg6: memref<3x128x128xf32, #tpu.memory_space<vmem>>, %arg7: memref<1x128xf32, #tpu.memory_space<vmem>>, %arg8: memref<1x16x128xf32, #tpu.memory_space<vmem>>, %arg9: memref<18x64xf32, #tpu.memory_space<vmem>>, %arg10: memref<18x128xf32, #tpu.memory_space<vmem>>, %arg11: memref<18x128xf32, #tpu.memory_space<vmem>>) attributes {dimension_semantics = [#tpu.dimension_semantics<parallel>], iteration_bounds = array<i64: 2>, scalar_prefetch = 0 : i64, scratch_operands = 3 : i64, tpu.core_type = #tpu.core_type<tc>, window_params = [{transform_indices = @transform_0, window_bounds = array<i64: 1, 16, 64>}, {pipeline_mode = #tpu.pipeline_mode<synchronous>, transform_indices = @transform_1, window_bounds = array<i64: 3, 64, 128>}, {pipeline_mode = #tpu.pipeline_mode<synchronous>, transform_indices = @transform_2, window_bounds = array<i64: 1, 128>}, {pipeline_mode = #tpu.pipeline_mode<synchronous>, transform_indices = @transform_3, window_bounds = array<i64: 3, 128, 128>}, {pipeline_mode = #tpu.pipeline_mode<synchronous>, transform_indices = @transform_4, window_bounds = array<i64: 1, 128>}, {pipeline_mode = #tpu.pipeline_mode<synchronous>, transform_indices = @transform_5, window_bounds = array<i64: 3, 128, 128>}, {pipeline_mode = #tpu.pipeline_mode<synchronous>, transform_indices = @transform_6, window_bounds = array<i64: 1, 128>}, {transform_indices = @transform_7, window_bounds = array<i64: 1, 16, 128>}]} {
    %cst = arith.constant 0.000000e+00 : f32
    %0 = vector.broadcast %cst : f32 to vector<18x64xf32>
    %c0 = arith.constant 0 : index
    %c0_0 = arith.constant 0 : index
    %1 = vector.load %arg9[%c0, %c0_0] : memref<18x64xf32, #tpu.memory_space<vmem>>, vector<18x64xf32>
    tpu.vector_store %arg9[%c0, %c0_0], %0 {strides = array<i32>} : memref<18x64xf32, #tpu.memory_space<vmem>>, vector<18x64xf32>,
    %cst_1 = arith.constant 0.000000e+00 : f32
    %2 = vector.broadcast %cst_1 : f32 to vector<18x128xf32>
    %c0_2 = arith.constant 0 : index
    %c0_3 = arith.constant 0 : index
    %3 = vector.load %arg10[%c0_2, %c0_3] : memref<18x128xf32, #tpu.memory_space<vmem>>, vector<18x128xf32>
    tpu.vector_store %arg10[%c0_2, %c0_3], %2 {strides = array<i32>} : memref<18x128xf32, #tpu.memory_space<vmem>>, vector<18x128xf32>,
    %cst_4 = arith.constant 0.000000e+00 : f32
    %4 = vector.broadcast %cst_4 : f32 to vector<18x128xf32>
    %c0_5 = arith.constant 0 : index
    %c0_6 = arith.constant 0 : index
    %5 = vector.load %arg11[%c0_5, %c0_6] : memref<18x128xf32, #tpu.memory_space<vmem>>, vector<18x128xf32>
    tpu.vector_store %arg11[%c0_5, %c0_6], %4 {strides = array<i32>} : memref<18x128xf32, #tpu.memory_space<vmem>>, vector<18x128xf32>,
    %c0_7 = arith.constant 0 : index
    %c0_8 = arith.constant 0 : index
    %c0_9 = arith.constant 0 : index
    %6 = vector.load %arg1[%c0_7, %c0_8, %c0_9] : memref<1x16x64xf32, #tpu.memory_space<vmem>>, vector<1x16x64xf32>
    %7 = vector.shape_cast %6 : vector<1x16x64xf32> to vector<16x64xf32>
    %c1 = arith.constant 1 : index
    %c0_10 = arith.constant 0 : index
    %8 = vector.load %arg9[%c1, %c0_10] : memref<18x64xf32, #tpu.memory_space<vmem>>, vector<16x64xf32>
    tpu.vector_store %arg9[%c1, %c0_10], %7 {strides = array<i32>} : memref<18x64xf32, #tpu.memory_space<vmem>>, vector<16x64xf32>,
    %cst_11 = arith.constant 0.000000e+00 : f32
    %9 = vector.broadcast %cst_11 : f32 to vector<16x128xf32>
    %c0_12 = arith.constant 0 : index
    %c0_13 = arith.constant 0 : index
    %10 = vector.load %arg9[%c0_12, %c0_13] : memref<18x64xf32, #tpu.memory_space<vmem>>, vector<16x64xf32>
    %c0_14 = arith.constant 0 : index
    %c0_15 = arith.constant 0 : index
    %c0_16 = arith.constant 0 : index
    %11 = vector.load %arg2[%c0_14, %c0_15, %c0_16] : memref<3x64x128xf32, #tpu.memory_space<vmem>>, vector<1x64x128xf32>
    %12 = vector.shape_cast %11 : vector<1x64x128xf32> to vector<64x128xf32>
    %cst_17 = arith.constant dense<0.000000e+00> : vector<16x128xf32>
    %13 = tpu.matmul %10, %12, %cst_17 {dimension_numbers = #tpu.dot_dimension_numbers<[1], [0], [0], [1], [0, 0, 1, 1], [], []>} : vector<16x64xf32>, vector<64x128xf32>, vector<16x128xf32> -> vector<16x128xf32>
    %14 = arith.addf %9, %13 : vector<16x128xf32>
    %c1_18 = arith.constant 1 : index
    %c0_19 = arith.constant 0 : index
    %15 = vector.load %arg9[%c1_18, %c0_19] : memref<18x64xf32, #tpu.memory_space<vmem>>, vector<16x64xf32>
    %c1_20 = arith.constant 1 : index
    %c0_21 = arith.constant 0 : index
    %c0_22 = arith.constant 0 : index
    %16 = vector.load %arg2[%c1_20, %c0_21, %c0_22] : memref<3x64x128xf32, #tpu.memory_space<vmem>>, vector<1x64x128xf32>
    %17 = vector.shape_cast %16 : vector<1x64x128xf32> to vector<64x128xf32>
    %cst_23 = arith.constant dense<0.000000e+00> : vector<16x128xf32>
    %18 = tpu.matmul %15, %17, %cst_23 {dimension_numbers = #tpu.dot_dimension_numbers<[1], [0], [0], [1], [0, 0, 1, 1], [], []>} : vector<16x64xf32>, vector<64x128xf32>, vector<16x128xf32> -> vector<16x128xf32>
    %19 = arith.addf %14, %18 : vector<16x128xf32>
    %c2 = arith.constant 2 : index
    %c0_24 = arith.constant 0 : index
    %20 = vector.load %arg9[%c2, %c0_24] : memref<18x64xf32, #tpu.memory_space<vmem>>, vector<16x64xf32>
    %c2_25 = arith.constant 2 : index
    %c0_26 = arith.constant 0 : index
    %c0_27 = arith.constant 0 : index
    %21 = vector.load %arg2[%c2_25, %c0_26, %c0_27] : memref<3x64x128xf32, #tpu.memory_space<vmem>>, vector<1x64x128xf32>
    %22 = vector.shape_cast %21 : vector<1x64x128xf32> to vector<64x128xf32>
    %cst_28 = arith.constant dense<0.000000e+00> : vector<16x128xf32>
    %23 = tpu.matmul %20, %22, %cst_28 {dimension_numbers = #tpu.dot_dimension_numbers<[1], [0], [0], [1], [0, 0, 1, 1], [], []>} : vector<16x64xf32>, vector<64x128xf32>, vector<16x128xf32> -> vector<16x128xf32>
    %24 = arith.addf %19, %23 : vector<16x128xf32>
    %c0_29 = arith.constant 0 : index
    %c0_30 = arith.constant 0 : index
    %25 = vector.load %arg3[%c0_29, %c0_30] : memref<1x128xf32, #tpu.memory_space<vmem>>, vector<1x128xf32>
    %26 = vector.broadcast %25 : vector<1x128xf32> to vector<16x128xf32>
    %27 = arith.addf %24, %26 : vector<16x128xf32>
    %cst_31 = arith.constant 0.000000e+00 : f32
    %28 = vector.broadcast %cst_31 : f32 to vector<16x128xf32>
    %29 = arith.cmpf oge, %27, %28 : vector<16x128xf32>
    %cst_32 = arith.constant 2.000000e-01 : f32
    %30 = vector.broadcast %cst_32 : f32 to vector<16x128xf32>
    %31 = arith.mulf %30, %27 : vector<16x128xf32>
    %32 = arith.select %29, %27, %31 : vector<16x128xi1>, vector<16x128xf32>
    %c1_33 = arith.constant 1 : index
    %c0_34 = arith.constant 0 : index
    %33 = vector.load %arg10[%c1_33, %c0_34] : memref<18x128xf32, #tpu.memory_space<vmem>>, vector<16x128xf32>
    tpu.vector_store %arg10[%c1_33, %c0_34], %32 {strides = array<i32>} : memref<18x128xf32, #tpu.memory_space<vmem>>, vector<16x128xf32>,
    %cst_35 = arith.constant 0.000000e+00 : f32
    %34 = vector.broadcast %cst_35 : f32 to vector<16x128xf32>
    %c0_36 = arith.constant 0 : index
    %c0_37 = arith.constant 0 : index
    %35 = vector.load %arg10[%c0_36, %c0_37] : memref<18x128xf32, #tpu.memory_space<vmem>>, vector<16x128xf32>
    %c0_38 = arith.constant 0 : index
    %c0_39 = arith.constant 0 : index
    %c0_40 = arith.constant 0 : index
    %36 = vector.load %arg4[%c0_38, %c0_39, %c0_40] : memref<3x128x128xf32, #tpu.memory_space<vmem>>, vector<1x128x128xf32>
    %37 = vector.shape_cast %36 : vector<1x128x128xf32> to vector<128x128xf32>
    %cst_41 = arith.constant dense<0.000000e+00> : vector<16x128xf32>
    %38 = tpu.matmul %35, %37, %cst_41 {dimension_numbers = #tpu.dot_dimension_numbers<[1], [0], [0], [1], [0, 0, 1, 1], [], []>} : vector<16x128xf32>, vector<128x128xf32>, vector<16x128xf32> -> vector<16x128xf32>
    %39 = arith.addf %34, %38 : vector<16x128xf32>
    %c1_42 = arith.constant 1 : index
    %c0_43 = arith.constant 0 : index
    %40 = vector.load %arg10[%c1_42, %c0_43] : memref<18x128xf32, #tpu.memory_space<vmem>>, vector<16x128xf32>
    %c1_44 = arith.constant 1 : index
    %c0_45 = arith.constant 0 : index
    %c0_46 = arith.constant 0 : index
    %41 = vector.load %arg4[%c1_44, %c0_45, %c0_46] : memref<3x128x128xf32, #tpu.memory_space<vmem>>, vector<1x128x128xf32>
    %42 = vector.shape_cast %41 : vector<1x128x128xf32> to vector<128x128xf32>
    %cst_47 = arith.constant dense<0.000000e+00> : vector<16x128xf32>
    %43 = tpu.matmul %40, %42, %cst_47 {dimension_numbers = #tpu.dot_dimension_numbers<[1], [0], [0], [1], [0, 0, 1, 1], [], []>} : vector<16x128xf32>, vector<128x128xf32>, vector<16x128xf32> -> vector<16x128xf32>
    %44 = arith.addf %39, %43 : vector<16x128xf32>
    %c2_48 = arith.constant 2 : index
    %c0_49 = arith.constant 0 : index
    %45 = vector.load %arg10[%c2_48, %c0_49] : memref<18x128xf32, #tpu.memory_space<vmem>>, vector<16x128xf32>
    %c2_50 = arith.constant 2 : index
    %c0_51 = arith.constant 0 : index
    %c0_52 = arith.constant 0 : index
    %46 = vector.load %arg4[%c2_50, %c0_51, %c0_52] : memref<3x128x128xf32, #tpu.memory_space<vmem>>, vector<1x128x128xf32>
    %47 = vector.shape_cast %46 : vector<1x128x128xf32> to vector<128x128xf32>
    %cst_53 = arith.constant dense<0.000000e+00> : vector<16x128xf32>
    %48 = tpu.matmul %45, %47, %cst_53 {dimension_numbers = #tpu.dot_dimension_numbers<[1], [0], [0], [1], [0, 0, 1, 1], [], []>} : vector<16x128xf32>, vector<128x128xf32>, vector<16x128xf32> -> vector<16x128xf32>
    %49 = arith.addf %44, %48 : vector<16x128xf32>
    %c0_54 = arith.constant 0 : index
    %c0_55 = arith.constant 0 : index
    %50 = vector.load %arg5[%c0_54, %c0_55] : memref<1x128xf32, #tpu.memory_space<vmem>>, vector<1x128xf32>
    %51 = vector.broadcast %50 : vector<1x128xf32> to vector<16x128xf32>
    %52 = arith.addf %49, %51 : vector<16x128xf32>
    %cst_56 = arith.constant 0.000000e+00 : f32
    %53 = vector.broadcast %cst_56 : f32 to vector<16x128xf32>
    %54 = arith.cmpf oge, %52, %53 : vector<16x128xf32>
    %cst_57 = arith.constant 2.000000e-01 : f32
    %55 = vector.broadcast %cst_57 : f32 to vector<16x128xf32>
    %56 = arith.mulf %55, %52 : vector<16x128xf32>
    %57 = arith.select %54, %52, %56 : vector<16x128xi1>, vector<16x128xf32>
    %c1_58 = arith.constant 1 : index
    %c0_59 = arith.constant 0 : index
    %58 = vector.load %arg11[%c1_58, %c0_59] : memref<18x128xf32, #tpu.memory_space<vmem>>, vector<16x128xf32>
    tpu.vector_store %arg11[%c1_58, %c0_59], %57 {strides = array<i32>} : memref<18x128xf32, #tpu.memory_space<vmem>>, vector<16x128xf32>,
    %cst_60 = arith.constant 0.000000e+00 : f32
    %59 = vector.broadcast %cst_60 : f32 to vector<16x128xf32>
    %c0_61 = arith.constant 0 : index
    %c0_62 = arith.constant 0 : index
    %60 = vector.load %arg11[%c0_61, %c0_62] : memref<18x128xf32, #tpu.memory_space<vmem>>, vector<16x128xf32>
    %c0_63 = arith.constant 0 : index
    %c0_64 = arith.constant 0 : index
    %c0_65 = arith.constant 0 : index
    %61 = vector.load %arg6[%c0_63, %c0_64, %c0_65] : memref<3x128x128xf32, #tpu.memory_space<vmem>>, vector<1x128x128xf32>
    %62 = vector.shape_cast %61 : vector<1x128x128xf32> to vector<128x128xf32>
    %cst_66 = arith.constant dense<0.000000e+00> : vector<16x128xf32>
    %63 = tpu.matmul %60, %62, %cst_66 {dimension_numbers = #tpu.dot_dimension_numbers<[1], [0], [0], [1], [0, 0, 1, 1], [], []>} : vector<16x128xf32>, vector<128x128xf32>, vector<16x128xf32> -> vector<16x128xf32>
    %64 = arith.addf %59, %63 : vector<16x128xf32>
    %c1_67 = arith.constant 1 : index
    %c0_68 = arith.constant 0 : index
    %65 = vector.load %arg11[%c1_67, %c0_68] : memref<18x128xf32, #tpu.memory_space<vmem>>, vector<16x128xf32>
    %c1_69 = arith.constant 1 : index
    %c0_70 = arith.constant 0 : index
    %c0_71 = arith.constant 0 : index
    %66 = vector.load %arg6[%c1_69, %c0_70, %c0_71] : memref<3x128x128xf32, #tpu.memory_space<vmem>>, vector<1x128x128xf32>
    %67 = vector.shape_cast %66 : vector<1x128x128xf32> to vector<128x128xf32>
    %cst_72 = arith.constant dense<0.000000e+00> : vector<16x128xf32>
    %68 = tpu.matmul %65, %67, %cst_72 {dimension_numbers = #tpu.dot_dimension_numbers<[1], [0], [0], [1], [0, 0, 1, 1], [], []>} : vector<16x128xf32>, vector<128x128xf32>, vector<16x128xf32> -> vector<16x128xf32>
    %69 = arith.addf %64, %68 : vector<16x128xf32>
    %c2_73 = arith.constant 2 : index
    %c0_74 = arith.constant 0 : index
    %70 = vector.load %arg11[%c2_73, %c0_74] : memref<18x128xf32, #tpu.memory_space<vmem>>, vector<16x128xf32>
    %c2_75 = arith.constant 2 : index
    %c0_76 = arith.constant 0 : index
    %c0_77 = arith.constant 0 : index
    %71 = vector.load %arg6[%c2_75, %c0_76, %c0_77] : memref<3x128x128xf32, #tpu.memory_space<vmem>>, vector<1x128x128xf32>
    %72 = vector.shape_cast %71 : vector<1x128x128xf32> to vector<128x128xf32>
    %cst_78 = arith.constant dense<0.000000e+00> : vector<16x128xf32>
    %73 = tpu.matmul %70, %72, %cst_78 {dimension_numbers = #tpu.dot_dimension_numbers<[1], [0], [0], [1], [0, 0, 1, 1], [], []>} : vector<16x128xf32>, vector<128x128xf32>, vector<16x128xf32> -> vector<16x128xf32>
    %74 = arith.addf %69, %73 : vector<16x128xf32>
    %c0_79 = arith.constant 0 : index
    %c0_80 = arith.constant 0 : index
    %75 = vector.load %arg7[%c0_79, %c0_80] : memref<1x128xf32, #tpu.memory_space<vmem>>, vector<1x128xf32>
    %76 = vector.broadcast %75 : vector<1x128xf32> to vector<16x128xf32>
    %77 = arith.addf %74, %76 : vector<16x128xf32>
    %cst_81 = arith.constant 0.000000e+00 : f32
    %78 = vector.broadcast %cst_81 : f32 to vector<16x128xf32>
    %79 = arith.cmpf oge, %77, %78 : vector<16x128xf32>
    %cst_82 = arith.constant 2.000000e-01 : f32
    %80 = vector.broadcast %cst_82 : f32 to vector<16x128xf32>
    %81 = arith.mulf %80, %77 : vector<16x128xf32>
    %82 = arith.select %79, %77, %81 : vector<16x128xi1>, vector<16x128xf32>
    %c0_83 = arith.constant 0 : index
    %c0_84 = arith.constant 0 : index
    %c0_85 = arith.constant 0 : index
    %83 = vector.load %arg8[%c0_83, %c0_84, %c0_85] : memref<1x16x128xf32, #tpu.memory_space<vmem>>, vector<1x16x128xf32>
    %84 = vector.shape_cast %83 : vector<1x16x128xf32> to vector<16x128xf32>
    %85 = vector.shape_cast %82 : vector<16x128xf32> to vector<1x16x128xf32>
    tpu.vector_store %arg8[%c0_83, %c0_84, %c0_85], %85 {strides = array<i32>} : memref<1x16x128xf32, #tpu.memory_space<vmem>>, vector<1x16x128xf32>,
    return
  }
  func.func @transform_0(%arg0: i32) -> (i32, i32, i32) {
    %c0_i32 = arith.constant 0 : i32
    %c0_i32_0 = arith.constant 0 : i32
    %c0_i32_1 = arith.constant 0 : i32
    return %arg0, %c0_i32, %c0_i32_0 : i32, i32, i32
  }
  func.func @transform_1(%arg0: i32) -> (i32, i32, i32) {
    %c0_i32 = arith.constant 0 : i32
    %c0_i32_0 = arith.constant 0 : i32
    %c0_i32_1 = arith.constant 0 : i32
    %c0_i32_2 = arith.constant 0 : i32
    return %c0_i32, %c0_i32_0, %c0_i32_1 : i32, i32, i32
  }
  func.func @transform_2(%arg0: i32) -> (i32, i32) {
    %c0_i32 = arith.constant 0 : i32
    %c0_i32_0 = arith.constant 0 : i32
    %c0_i32_1 = arith.constant 0 : i32
    return %c0_i32, %c0_i32_0 : i32, i32
  }
  func.func @transform_3(%arg0: i32) -> (i32, i32, i32) {
    %c0_i32 = arith.constant 0 : i32
    %c0_i32_0 = arith.constant 0 : i32
    %c0_i32_1 = arith.constant 0 : i32
    %c0_i32_2 = arith.constant 0 : i32
    return %c0_i32, %c0_i32_0, %c0_i32_1 : i32, i32, i32
  }
  func.func @transform_4(%arg0: i32) -> (i32, i32) {
    %c0_i32 = arith.constant 0 : i32
    %c0_i32_0 = arith.constant 0 : i32
    %c0_i32_1 = arith.constant 0 : i32
    return %c0_i32, %c0_i32_0 : i32, i32
  }
  func.func @transform_5(%arg0: i32) -> (i32, i32, i32) {
    %c0_i32 = arith.constant 0 : i32
    %c0_i32_0 = arith.constant 0 : i32
    %c0_i32_1 = arith.constant 0 : i32
    %c0_i32_2 = arith.constant 0 : i32
    return %c0_i32, %c0_i32_0, %c0_i32_1 : i32, i32, i32
  }
  func.func @transform_6(%arg0: i32) -> (i32, i32) {
    %c0_i32 = arith.constant 0 : i32
    %c0_i32_0 = arith.constant 0 : i32
    %c0_i32_1 = arith.constant 0 : i32
    return %c0_i32, %c0_i32_0 : i32, i32
  }
  func.func @transform_7(%arg0: i32) -> (i32, i32, i32) {
    %c0_i32 = arith.constant 0 : i32
    %c0_i32_0 = arith.constant 0 : i32
    %c0_i32_1 = arith.constant 0 : i32
    return %arg0, %c0_i32, %c0_i32_0 : i32, i32, i32
  }
}

</mosaic_0001>

<bundles_post_ra>
// kernel: tpu_custom_call.1
= control target key start
LH: loop header
LB: loop body
LE: loop exit
PB: predicated region body
PF: predicated region fallthrough
CT: control target
= control target key end

     0   :  { %12 = vsyncpa [#allocation6], 0  ;;  %s2674_s0 = inlined_call_operand.hbm [shape: f32[2,16,64], index: 0, kind: input, shape index: {}]   ;;  %s2675_s1 = inlined_call_operand.hbm [shape: f32[3,64,128], index: 1, kind: input, shape index: {}]   ;;  %s2676_s2 = inlined_call_operand.vmem [shape: f32[1,128], index: 2, kind: input, shape index: {}]   ;;  %s2677_s3 = inlined_call_operand.hbm [shape: f32[3,128,128], index: 3, kind: input, shape index: {}]   ;;  %s2678_s4 = inlined_call_operand.vmem [shape: f32[1,128], index: 4, kind: input, shape index: {}]   ;;  %s2679_s5 = inlined_call_operand.hbm [shape: f32[3,128,128], index: 5, kind: input, shape index: {}]   ;;  %s2680_s6 = inlined_call_operand.vmem [shape: f32[1,128], index: 6, kind: input, shape index: {}]   ;;  %s2681_s7 = inlined_call_operand.hbm [shape: f32[2,16,128], index: 7, kind: output, shape index: {}]  }
   0x1   :  { %14 = vsyncpa [#allocation6 + $0x1], 0 }
   0x2   :  { %15 = vsyncpa [#allocation9], 0 }
   0x3   :  { %16 = vsyncpa [#allocation12], 0 }
   0x4   :  { %17 = vsyncpa [#allocation7], 0 }
   0x5   :  { %19 = vsyncpa [#allocation7 + $0x1], 0  ;;  %s2376_s24 = smov 0   ;;  %s2378_s25 = smov 0  }
   0x6   :  { %s2380_s26 = smov 0   ;;  %s2382_s27 = smov 0  }
   0x7 LB: > { %s2397_s28 = sadd.s32 4294967295, %s2324_s27   ;;  %s1366_s29 = sadd.s32 4294967294, %s2324_s27   ;;  %s2324_s27 = sphi %s2382_s27, %s2707_s27   ;;  %s2320_s26 = sphi %s2380_s26, %s2706_s26   ;;  %s2316_s25 = sphi %s2378_s25, %s2705_s25   ;;  %s2312_s24 = sphi %s2376_s24, %s2704_s24  }
   0x8   : > { %p45_p0 = scmp.ne.s32.totalorder %s2316_s25, %s2312_s24  ;;  %p2682_p1 = scmp.eq.s32.totalorder %s2397_s28, 0 }
   0x9   : > { %p201_p3 = scmp.eq.s32.totalorder %s1366_s29, 1  ;;  %p1367_p5 = scmp.ge.s32.totalorder %s2324_s27, 1 }
   0xa   : > { %p2406_p4 = por %p2682_p1, %p45_p0  ;;  %p208_p7 = scmp.lt.s32.totalorder %s2324_s27, 3 }
   0xb   : > { %p2411_p6 = por %p201_p3, %p45_p0  ;;  %s2326_s10 = smov [#allocation8]  }
   0xc   : > { %s2686_s30 = scalar_select %p2406_p4, 1, 0 }
   0xd   : > { %s2687_s8 = scalar_select %p2411_p6, 1, 0 }
   0xe   : > { %p2416_p8 = pnand %p1367_p5, %p208_p7  ;;  %s220_s11 = sshll.u32 %s2326_s10, 4  ;;  %s2420_s11 = int_to_ptr.vmem [resolvable:$true] %s220_s11 }
   0xf   : > { %2688 = sst [smem:[#allocation18_spill]] %s2687_s8  ;;  %s2327_s13 = smov [#allocation10]  }
  0x10   : > { %s2689_s9 = scalar_select %p2416_p8, 1, 0 }
  0x11   : > { %p2070_p9 = pneg %p2416_p8  ;;  %s236_s14 = sshll.u32 %s2327_s13, 4  ;;  %s2431_s14 = int_to_ptr.vmem [resolvable:$true] %s236_s14 }
  0x12   : > { %s2328_s15 = smov [#allocation11]   ;;  %s2136_s19 = scalar_lea.hbm %s2675_s1, 3072 }
  0x13   : > { %p2427_p11 = pnand %p2070_p9, %p2682_p1  ;;  %s2433_s16 = sshll.u32 %s2328_s15, 4  ;;  %s253_s16 = int_to_ptr.vmem [resolvable:$true] %s2433_s16 }
  0x14   : > { %p2137_p12 = scmp.ne.s32.totalorder %s2675_s1, %s2136_s19  ;;  %p2143_p5 = scmp.lt.u32.totalorder %s2136_s19, %s2675_s1 }
  0x15   : > { %p2443_p13 = pneg %p2427_p11 }
  0x17   : > { %p2139_p0 = pnand %p2443_p13, %p2137_p12 }
  0x19   : > { %p2140_p3 = pneg %p2139_p0 }
  0x1b   : > { %p2145_p7 = pnand %p2143_p5, %p2140_p3 }
  0x1d   : > { %2148 = shalt.err (!%p2145_p7)
}
  0x1e   : > { %s2149_s10 = scalar_lea.vmem %s2420_s11, 3072  ;;  %p2157_p2 = scmp.lt.s32.totalorder %s2420_s11, %s2420_s11 }
  0x1f   : > { %p2150_p9 = scmp.ne.s32.totalorder %s2420_s11, %s2149_s10  ;;  %p2158_p6 = scmp.lt.s32.totalorder %s2149_s10, %s2149_s10 }
  0x21   : > { %p2152_p10 = pnand %p2150_p9, %p2443_p13  ;;  %p2159_p12 = por %p2158_p6, %p2157_p2 }
  0x23   : > { %p2153_p1 = pneg %p2152_p10 }
  0x25   : > { %p2160_p0 = pnand %p2159_p12, %p2153_p1 }
  0x27   : > { %2163 = shalt.err (!%p2160_p0)
}
  0x28   : > { %s2329_s13 = smov 128   ;;  %s2330_s15 = smov 8  }
  0x29   : > { %2073 = dma.hbm_to_vmem [thread:$0]  (!%p2427_p11), %s2675_s1, 3072, %s2420_s11, [#allocation9], %s2329_s13, %s2329_s13, %s2330_s15  }
  0x2a   : > { %s2164_s21 = scalar_lea.hbm %s2677_s3, 6144 }
  0x2b   : > { %p2165_p1 = scmp.ne.s32.totalorder %s2677_s3, %s2164_s21  ;;  %p2171_p10 = scmp.lt.u32.totalorder %s2164_s21, %s2677_s3 }
  0x2d   : > { %p2167_p2 = pnand %p2165_p1, %p2443_p13 }
  0x2f   : > { %p2168_p6 = pneg %p2167_p2 }
  0x31   : > { %p2173_p3 = pnand %p2171_p10, %p2168_p6 }
  0x33   : > { %2176 = shalt.err (!%p2173_p3)
}
  0x34   : > { %s2177_s11 = scalar_lea.vmem %s2431_s14, 6144  ;;  %p2185_p12 = scmp.lt.s32.totalorder %s2431_s14, %s2431_s14 }
  0x35   : > { %p2178_p5 = scmp.ne.s32.totalorder %s2431_s14, %s2177_s11  ;;  %p2186_p0 = scmp.lt.s32.totalorder %s2177_s11, %s2177_s11 }
  0x37   : > { %p2180_p7 = pnand %p2178_p5, %p2443_p13  ;;  %p2187_p1 = por %p2186_p0, %p2185_p12 }
  0x39   : > { %p2181_p9 = pneg %p2180_p7 }
  0x3b   : > { %p2188_p2 = pnand %p2187_p1, %p2181_p9 }
  0x3d   : > { %2191 = shalt.err (!%p2188_p2)
}
  0x3e   : > { %2076 = dma.hbm_to_vmem [thread:$0]  (!%p2427_p11), %s2677_s3, 6144, %s2431_s14, [#allocation9], %s2329_s13, %s2329_s13, %s2330_s15  }
  0x3f   : > { %s2192_s20 = scalar_lea.hbm %s2679_s5, 6144 }
  0x40   : > { %p2193_p6 = scmp.ne.s32.totalorder %s2679_s5, %s2192_s20  ;;  %p2199_p5 = scmp.lt.u32.totalorder %s2192_s20, %s2679_s5 }
  0x42   : > { %p2195_p10 = pnand %p2193_p6, %p2443_p13 }
  0x44   : > { %p2196_p3 = pneg %p2195_p10 }
  0x46   : > { %p2201_p7 = pnand %p2199_p5, %p2196_p3 }
  0x48   : > { %2204 = shalt.err (!%p2201_p7)
}
  0x49   : > { %s2205_s11 = scalar_lea.vmem %s253_s16, 6144  ;;  %p2213_p1 = scmp.lt.s32.totalorder %s253_s16, %s253_s16 }
  0x4a   : > { %p2206_p9 = scmp.ne.s32.totalorder %s253_s16, %s2205_s11  ;;  %p2214_p2 = scmp.lt.s32.totalorder %s2205_s11, %s2205_s11 }
  0x4c   : > { %p2208_p12 = pnand %p2206_p9, %p2443_p13  ;;  %p2215_p4 = por %p2214_p2, %p2213_p1 }
  0x4e   : > { %p2209_p0 = pneg %p2208_p12 }
  0x50   : > { %p2216_p8 = pnand %p2215_p4, %p2209_p0 }
  0x52   : > { %2219 = shalt.err (!%p2216_p8)
}
  0x53   : > { %2079 = dma.hbm_to_vmem [thread:$0]  (!%p2427_p11), %s2679_s5, 6144, %s253_s16, [#allocation12], %s2329_s13, %s2329_s13, %s2330_s15  }
  0x54   : > { %s2516_s22 = sadd.s32 1, %s2324_s27   ;;  %s32_s17 = sadd.s32 1, %s2320_s26 }
  0x55   : > { %s29_s12 = ssub.s32 %s2324_s27, %s2516_s22  ;;  %p39_p8 = scmp.ne.s32.totalorder %s2320_s26, %s2316_s25 }
  0x56   : > { %p30_p4 = scmp.eq.s32.totalorder %s29_s12, 0  ;;  %p40_p13 = scmp.eq.s32.totalorder %s2324_s27, 0 }
  0x57   : > { %p2091_p6 = scmp.lt.s32.totalorder %s2324_s27, 2  ;;  %p2692_p3 = scmp.eq.s32.totalorder %s2397_s28, 1 }
  0x58   : > { %s2526_s18 = scalar_select %p30_p4, %s2320_s26, %s32_s17  }
  0x59   : > { %p41_p10 = por %p40_p13, %p39_p8  ;;  %p2530_p5 = por %p2692_p3, %p39_p8 }
  0x5a   : > { %s269_s20 = sand.u32 1, %s2320_s26   ;;  %s1395_s21 = sshll.u32 %s2324_s27, 8 }
  0x5b   : > { %s1372_s16 = sshll.u32 %s269_s20, 4  ;;  %s2539_s10 = scalar_lea.hbm %s2674_s0, %s1395_s21 }
  0x5c   : > { %s273_s11 = scalar_lea.vmem [#allocation5], %s1372_s16  ;;  %p2541_p11 = pnand %p2091_p6, %p41_p10 }
  0x5d   : > { %s280_s14 = sshll.u32 %s273_s11, 4  ;;  %s2547_s12 = scalar_lea.sflag [#allocation6], %s269_s20  ;;  %s2545_s14 = int_to_ptr.vmem [resolvable:$true] %s280_s14 }
  0x5e   : > { %s2220_s17 = scalar_lea.hbm %s2539_s10, 256  ;;  %p2222_p9 = pneg %p2541_p11 }
  0x5f   : > { %p2221_p7 = scmp.ne.s32.totalorder %s2539_s10, %s2220_s17  ;;  %s2225_s23 = scalar_lea.hbm %s2674_s0, 512 }
  0x60   : > { %p2226_p1 = scmp.lt.u32.totalorder %s2539_s10, %s2674_s0  ;;  %p2227_p2 = scmp.lt.u32.totalorder %s2225_s23, %s2220_s17 }
  0x61   : > { %p2223_p12 = pnand %p2222_p9, %p2221_p7  ;;  %p2229_p8 = scmp.lt.u32.totalorder %s2220_s17, %s2539_s10 }
  0x62   : > { %p2228_p4 = por %p2227_p2, %p2226_p1 }
  0x63   : > { %p2224_p0 = pneg %p2223_p12 }
  0x64   : > { %p2230_p13 = por %p2229_p8, %p2228_p4 }
  0x66   : > { %p2231_p6 = pnand %p2230_p13, %p2224_p0 }
  0x68   : > { %2234 = shalt.err (!%p2231_p6)
}
  0x69   : > { %s2235_s20 = scalar_lea.vmem %s2545_s14, 256  ;;  %s2331_s21 = smov [#allocation5]  }
  0x6a   : > { %p2236_p10 = scmp.ne.s32.totalorder %s2545_s14, %s2235_s20  ;;  %s2240_s16 = sshll.u32 %s2331_s21, 4  ;;  %s2241_s16 = int_to_ptr.vmem [resolvable:$false] %s2240_s16 }
  0x6b   : > { %s2242_s29 = scalar_lea.vmem %s2241_s16, 512  ;;  %p2243_p12 = scmp.lt.s32.totalorder %s2545_s14, %s2241_s16 }
  0x6c   : > { %p2238_p3 = pnand %p2236_p10, %p2222_p9  ;;  %p2244_p1 = scmp.lt.s32.totalorder %s2242_s29, %s2235_s20 }
  0x6e   : > { %p2239_p7 = pneg %p2238_p3  ;;  %p2245_p2 = por %p2244_p1, %p2243_p12 }
  0x70   : > { %p2246_p4 = pnand %p2245_p2, %p2239_p7 }
  0x72   : > { %2249 = shalt.err (!%p2246_p4)
}
  0x73   : > { %2083 = dma.hbm_to_vmem [thread:$0]  (!%p2541_p11), %s2539_s10, 256, %s2545_s14, %s2547_s12, %s2329_s13, %s2329_s13, %s2330_s15  }
  0x74   : > { %p2695_p9 = scmp.ne.s32.totalorder %s2689_s9, 0 }
  0x75   : > { %s2581_s17 = sand.u32 (!%p2695_p9), 1, %s2316_s25   ;;  %p2696_p0 = scmp.ne.s32.totalorder (!%p2695_p9), %s2686_s30, 0 }
  0x76   : > { %292 = sbr.rel (%p2695_p9) target bundleno = 970 (0x3ca), region = 48  ;;  %s1376_s23 = sshll.u32 (!%p2695_p9), %s2581_s17, 4 }
  0x77   : > { %s295_s11 = scalar_lea.sflag (!%p2695_p9), [#allocation6], %s2581_s17  ;;  %s2587_s8 = scalar_lea.vmem (!%p2695_p9), [#allocation5], %s1376_s23 }
  0x7d   : > { %2295 = dma.done.wait (%p2696_p0), %s295_s11, 256  }
  0x7e   : > { %2297 = vsyncadd (%p2696_p0), %s295_s11, 4294967040  ;;  %p2697_p11 = scmp.eq.s32.totalorder %s2397_s28, 0 }
  0x80   : > { %2299 = dma.done.wait (%p2697_p11), [#allocation9], 9216   ;;  %p2698_p8 = pmov %p2697_p11 }
  0x82   : > { %2301 = vsyncadd (%p2698_p8), [#allocation9], 4294958080  ;;  %p2699_p13 = pmov %p2698_p8 }
  0x83   : > { %p2700_p6 = pmov %p2698_p8 }
  0x84   : > { %2303 = dma.done.wait (%p2699_p13), [#allocation12], 6144  }
  0x85   : > { %2305 = vsyncadd (%p2700_p6), [#allocation12], 4294961152  ;;  %vm341_vm0 = vcmask 523264   ;;  %vm344_vm1 = vcmask 517120   ;;  %v2332_v0 = vmov 0.0   ;;  %v358_v1 = vld [vmem:[#allocation8] sm:$0xff] }
  0x86   : > { %342 = vst.msk [vmem:[#allocation2] sm:$0xff] %vm341_vm0, %v2332_v0  ;;  %343 = vst.msk [vmem:[#allocation2 + $0x8] sm:$0xff] %vm341_vm0, %v2332_v0  ;;  %v359_v2 = vld [vmem:[#allocation8 + $0x8] sm:$0xff]  ;;  %v360_v3 = vld [vmem:[#allocation8 + $0x10] sm:$0xff]  ;;  %s340_s12 = scalar_lea.vmem [#allocation13], %s1376_s23  ;;  %s1396_s21 = sshll.u32 %s2397_s28, 8 }
  0x87   : > { %346 = vst [vmem:[#allocation3] sm:$0xff] %v2332_v0  ;;  %347 = vst [vmem:[#allocation3 + $0x8] sm:$0xff] %v2332_v0  ;;  %v1818_v4 = vpack.c.bf16 %v359_v2, %v358_v1  ;;  %v361_v5 = vld [vmem:[#allocation8 + $0x18] sm:$0xff]  ;;  %v362_v7 = vld [vmem:[#allocation8 + $0x20] sm:$0xff]  ;;  %s1264_s20 = sshll.u32 %s340_s12, 4  ;;  %s2630_s23 = scalar_lea.hbm %s2681_s7, %s1396_s21  ;;  %s2625_s20 = int_to_ptr.vmem [resolvable:$true] %s1264_s20 }
  0x88   : > { %348 = vst [vmem:[#allocation3 + $0x10] sm:$0x3] %v2332_v0  ;;  %349 = vst [vmem:[#allocation4] sm:$0xff] %v2332_v0  ;;  %v1822_v6 = vpack.c.bf16 %v361_v5, %v360_v3  ;;  %v363_v8 = vld [vmem:[#allocation8 + $0x28] sm:$0xff]  ;;  %v369_v9 = vld [vmem:[#allocation8 + $0x40] sm:$0xff]  ;;  %s1251_s28 = scalar_lea.sflag [#allocation7], %s2581_s17 }
  0x89   : > { %350 = vst [vmem:[#allocation4 + $0x8] sm:$0xff] %v2332_v0  ;;  %351 = vst [vmem:[#allocation4 + $0x10] sm:$0x3] %v2332_v0  ;;  %1819 = vmatprep.subr.bf16.mxu0 %v1818_v4  ;;  %v370_v10 = vld [vmem:[#allocation8 + $0x48] sm:$0xff]  ;;  %v352_v11 = vld [vmem:[%s2587_s8] sm:$0xff]  ;;  %v1826_v15 = vpack.c.bf16 %v363_v8, %v362_v7  ;;  %s2250_s11 = scalar_lea.vmem %s2625_s20, 256 }
  0x8a   : > { %345 = vst.msk [vmem:[#allocation2 + $0x10] sm:$0x3] %vm344_vm1, %v2332_v0  ;;  %1821 = vmatpush3.bf16.msra.mxu0 %v1818_v4  ;;  %v1802_v12 = vpack.c.bf16 %v370_v10, %v369_v9  ;;  %v353_v13 = vld [vmem:[%s2587_s8 + $0x8] sm:$0xff]  ;;  %v371_v14 = vld [vmem:[#allocation8 + $0x50] sm:$0xff]  ;;  %v373_v20 = vld [vmem:[#allocation8 + $0x60] sm:$0xff]  ;;  %p2251_p10 = scmp.ne.s32.totalorder %s2625_s20, %s2250_s11  ;;  %s2333_s8 = smov [#allocation13]  }
  0x8b   : > { %354 = vst.msk [vmem:[#allocation2 + $0x1] sm:$0xff] %vm341_vm0, %v352_v11  ;;  %1823 = vmatprep.subr.bf16.mxu0 %v1822_v6  ;;  %v364_v16 = vld [vmem:[#allocation8 + $0x30] sm:$0xff]  ;;  %355 = vst.msk [vmem:[#allocation2 + $0x9] sm:$0xff] %vm341_vm0, %v353_v13  ;;  %v372_v17 = vld [vmem:[#allocation8 + $0x58] sm:$0xff]  ;;  %s2254_s30 = sshll.u32 %s2333_s8, 4  ;;  %s2255_s30 = int_to_ptr.vmem [resolvable:$false] %s2254_s30 }
  0x8c   : > { %v365_v18 = vld [vmem:[#allocation8 + $0x38] sm:$0xff]  ;;  %1803 = vmatprep.subr.bf16.mxu1 %v1802_v12  ;;  %v1806_v19 = vpack.c.bf16 %v372_v17, %v371_v14  ;;  %v374_v21 = vld [vmem:[#allocation8 + $0x68] sm:$0xff]  ;;  %v375_v24 = vld [vmem:[#allocation8 + $0x70] sm:$0xff]  ;;  %p2252_p3 = pnand %p2251_p10, %p2530_p5  ;;  %s2256_s9 = scalar_lea.vmem %s2255_s30, 512 }
  0x8d   : > { %1805 = vmatpush3.bf16.msra.mxu1 %v1802_v12  ;;  %v1830_v22 = vpack.c.bf16 %v365_v18, %v364_v16  ;;  %v1810_v23 = vpack.c.bf16 %v374_v21, %v373_v20  ;;  %v376_v25 = vld [vmem:[#allocation8 + $0x78] sm:$0xff]  ;;  %v542_v26 = vld [vmem:[#allocation8 + $0x80] sm:$0xff]  ;;  %v543_v27 = vld [vmem:[#allocation8 + $0x88] sm:$0xff]  ;;  %p2257_p12 = scmp.lt.s32.totalorder %s2625_s20, %s2255_s30  ;;  %p2258_p1 = scmp.lt.s32.totalorder %s2256_s9, %s2250_s11 }
  0x8e   : > { %1825 = vmatpush3.bf16.msra.mxu0 %v1822_v6  ;;  %1807 = vmatprep.subr.bf16.mxu1 %v1806_v19  ;;  %v1814_v30 = vpack.c.bf16 %v376_v25, %v375_v24  ;;  %v1834_v31 = vpack.c.bf16 %v543_v27, %v542_v26  ;;  %v544_v32 = vld [vmem:[#allocation8 + $0x90] sm:$0xff]  ;;  %v545_v33 = vld [vmem:[#allocation8 + $0x98] sm:$0xff]  ;;  %v671_v34 = vld [vmem:[#allocation10 + $0x80] sm:$0xff]  ;;  %p2253_p7 = pneg %p2252_p3 }
  0x8f   : > { %1827 = vmatprep.subr.bf16.mxu0 %v1826_v15  ;;  %v672_v35 = vld [vmem:[#allocation10 + $0x88] sm:$0xff]  ;;  %v1838_v37 = vpack.c.bf16 %v545_v33, %v544_v32  ;;  %v673_v40 = vld [vmem:[#allocation10 + $0x90] sm:$0xff]  ;;  %v674_v41 = vld [vmem:[#allocation10 + $0x98] sm:$0xff]  ;;  %p2259_p2 = por %p2258_p1, %p2257_p12 }
  0x90   : > { %v1850_v39 = vpack.c.bf16 %v672_v35, %v671_v34  ;;  %v546_v42 = vld [vmem:[#allocation8 + $0xa0] sm:$0xff]  ;;  %v547_v43 = vld [vmem:[#allocation8 + $0xa8] sm:$0xff]  ;;  %v1854_v45 = vpack.c.bf16 %v674_v41, %v673_v40  ;;  %v548_v49 = vld [vmem:[#allocation8 + $0xb0] sm:$0xff] }
  0x91   : > { %1809 = vmatpush3.bf16.msra.mxu1 %v1806_v19  ;;  %v1842_v46 = vpack.c.bf16 %v547_v43, %v546_v42  ;;  %v675_v47 = vld [vmem:[#allocation10 + $0xa0] sm:$0xff]  ;;  %v676_v48 = vld [vmem:[#allocation10 + $0xa8] sm:$0xff]  ;;  %v549_v50 = vld [vmem:[#allocation8 + $0xb8] sm:$0xff]  ;;  %p2260_p4 = pnand %p2259_p2, %p2253_p7 }
  0x92   : > { %v356_v28 = vld [vmem:[#allocation2] sm:$0xff]  ;;  %1829 = vmatpush3.bf16.msra.mxu0 %v1826_v15  ;;  %1811 = vmatprep.subr.bf16.mxu1 %v1810_v23  ;;  %v357_v36 = vld [vmem:[#allocation2 + $0x8] sm:$0xff]  ;;  %v1858_v51 = vpack.c.bf16 %v676_v48, %v675_v47  ;;  %v1846_v52 = vpack.c.bf16 %v549_v50, %v548_v49  ;;  %v677_v53 = vld [vmem:[#allocation10 + $0xb0] sm:$0xff] }
  0x93   : > { %v366_v29 = vld [vmem:[#allocation2 + $0x1] sm:$0xff]  ;;  %1570 = vmatprep.mubr.msk.f32.mxu0 %vm341_vm0, %v356_v28  ;;  %1831 = vmatprep.subr.bf16.mxu0 %v1830_v22  ;;  %v367_v44 = vld [vmem:[#allocation2 + $0x9] sm:$0xff]  ;;  %v681_v60 = vld [vmem:[#allocation10 + $0xd0] sm:$0xff] }
  0x94   : > { %1551 = vmatprep.mubr.msk.f32.mxu1 %vm341_vm0, %v366_v29  ;;  %v539_v38 = vld [vmem:[#allocation2 + $0x2] sm:$0xff]  ;;  %v540_v56 = vld [vmem:[#allocation2 + $0xa] sm:$0xff]  ;;  %v685_v2 = vld [vmem:[#allocation10 + $0xf0] sm:$0xff] }
  0x95   : > { %1813 = vmatpush3.bf16.msra.mxu1 %v1810_v23  ;;  %v678_v54 = vld [vmem:[#allocation10 + $0xb8] sm:$0xff]  ;;  %v679_v57 = vld [vmem:[#allocation10 + $0xc0] sm:$0xff]  ;;  %v680_v58 = vld [vmem:[#allocation10 + $0xc8] sm:$0xff] }
  0x96   : > { %1833 = vmatpush3.bf16.msra.mxu0 %v1830_v22  ;;  %1815 = vmatprep.subr.bf16.mxu1 %v1814_v30  ;;  %v1862_v55 = vpack.c.bf16 %v678_v54, %v677_v53  ;;  %v1866_v59 = vpack.c.bf16 %v680_v58, %v679_v57  ;;  %v682_v61 = vld [vmem:[#allocation10 + $0xd8] sm:$0xff]  ;;  %v683_v63 = vld [vmem:[#allocation10 + $0xe0] sm:$0xff]  ;;  %v684_v0 = vld [vmem:[#allocation10 + $0xe8] sm:$0xff] }
  0x97   : > { %1835 = vmatprep.subr.bf16.mxu0 %v1834_v31  ;;  %v1870_v62 = vpack.c.bf16 %v682_v61, %v681_v60  ;;  %v1874_v1 = vpack.c.bf16 %v684_v0, %v683_v63  ;;  %v686_v3 = vld [vmem:[#allocation10 + $0xf8] sm:$0xff]  ;;  %v652_v5 = vld [vmem:[#allocation10] sm:$0xff]  ;;  %v653_v6 = vld [vmem:[#allocation10 + $0x8] sm:$0xff] }
  0x98   : > { %v1878_v4 = vpack.c.bf16 %v686_v3, %v685_v2  ;;  %v1882_v7 = vpack.c.bf16 %v653_v6, %v652_v5  ;;  %v971_v8 = vld [vmem:[#allocation11 + $0x80] sm:$0xff]  ;;  %v972_v9 = vld [vmem:[#allocation11 + $0x88] sm:$0xff]  ;;  %v973_v10 = vld [vmem:[#allocation11 + $0x90] sm:$0xff] }
  0x99   : > { %1571 = vmatmul.mubr.msk.f32.vlgmr.msra.gmra.mrb[0].mxu0 %vm341_vm0, %v357_v36  ;;  %1817 = vmatpush3.bf16.msra.mxu1 %v1814_v30  ;;  %v1946_v11 = vpack.c.bf16 %v972_v9, %v971_v8  ;;  %v974_v12 = vld [vmem:[#allocation11 + $0x98] sm:$0xff]  ;;  %v975_v14 = vld [vmem:[#allocation11 + $0xa0] sm:$0xff]  ;;  %v976_v15 = vld [vmem:[#allocation11 + $0xa8] sm:$0xff] }
  0x9a   : > { %1837 = vmatpush3.bf16.msra.mxu0 %v1834_v31  ;;  %1589 = vmatprep.mubr.msk.f32.mxu0 %vm341_vm0, %v539_v38  ;;  %v1950_v13 = vpack.c.bf16 %v974_v12, %v973_v10  ;;  %v1954_v16 = vpack.c.bf16 %v976_v15, %v975_v14  ;;  %v977_v17 = vld [vmem:[#allocation11 + $0xb0] sm:$0xff]  ;;  %v978_v18 = vld [vmem:[#allocation11 + $0xb8] sm:$0xff]  ;;  %v979_v20 = vld [vmem:[#allocation11 + $0xc0] sm:$0xff] }
  0x9b   : > { %1839 = vmatprep.subr.bf16.mxu0 %v1838_v37  ;;  %1851 = vmatprep.subr.bf16.mxu1 %v1850_v39  ;;  %v1958_v19 = vpack.c.bf16 %v978_v18, %v977_v17  ;;  %v980_v21 = vld [vmem:[#allocation11 + $0xc8] sm:$0xff]  ;;  %v1387_v26 = vld [vmem:[%s2676_s2] ss:$0 sm:$0xff]  ;;  %v654_v33 = vld [vmem:[#allocation10 + $0x10] sm:$0xff] }
  0x9c   : > { %1552 = vmatmul.mubr.msk.f32.vlgmr.msra.gmra.mrb[0].mxu1 %vm341_vm0, %v367_v44  ;;  %v1962_v22 = vpack.c.bf16 %v980_v21, %v979_v20  ;;  %v655_v34 = vld [vmem:[#allocation10 + $0x18] sm:$0xff]  ;;  %v657_v40 = vld [vmem:[#allocation10 + $0x28] sm:$0xff]  ;;  %v658_v42 = vld [vmem:[#allocation10 + $0x30] sm:$0xff] }
  0x9d   : > { %1853 = vmatpush3.bf16.msra.mxu1 %v1850_v39  ;;  %v1886_v38 = vpack.c.bf16 %v655_v34, %v654_v33  ;;  %v656_v39 = vld [vmem:[#allocation10 + $0x20] sm:$0xff]  ;;  %v659_v43 = vld [vmem:[#allocation10 + $0x38] sm:$0xff]  ;;  %v661_v47 = vld [vmem:[#allocation10 + $0x48] sm:$0xff] }
  0x9e   : > { %1841 = vmatpush3.bf16.msra.mxu0 %v1838_v37  ;;  %1855 = vmatprep.subr.bf16.mxu1 %v1854_v45  ;;  %v1890_v41 = vpack.c.bf16 %v657_v40, %v656_v39  ;;  %v662_v49 = vld [vmem:[#allocation10 + $0x50] sm:$0xff]  ;;  %v663_v50 = vld [vmem:[#allocation10 + $0x58] sm:$0xff]  ;;  %v665_v53 = vld [vmem:[#allocation10 + $0x68] sm:$0xff] }
  0x9f   : > { %1843 = vmatprep.subr.bf16.mxu0 %v1842_v46  ;;  %v840_v58 = vld [vmem:[#allocation10 + $0x100] sm:$0xff]  ;;  %v842_v61 = vld [vmem:[#allocation10 + $0x110] sm:$0xff]  ;;  %v845_v2 = vld [vmem:[#allocation10 + $0x128] sm:$0xff] }
  0xa0   : > { %v846_v5 = vld [vmem:[#allocation10 + $0x130] sm:$0xff]  ;;  %v847_v6 = vld [vmem:[#allocation10 + $0x138] sm:$0xff]  ;;  %v848_v8 = vld [vmem:[#allocation10 + $0x140] sm:$0xff] }
  0xa1   : > { %1857 = vmatpush3.bf16.msra.mxu1 %v1854_v45  ;;  %v1894_v45 = vpack.c.bf16 %v659_v43, %v658_v42  ;;  %v849_v9 = vld [vmem:[#allocation10 + $0x148] sm:$0xff]  ;;  %v851_v12 = vld [vmem:[#allocation10 + $0x158] sm:$0xff]  ;;  %v852_v14 = vld [vmem:[#allocation10 + $0x160] sm:$0xff] }
  0xa2   : > { %1845 = vmatpush3.bf16.msra.mxu0 %v1842_v46  ;;  %1859 = vmatprep.subr.bf16.mxu1 %v1858_v51  ;;  %v660_v46 = vld [vmem:[#allocation10 + $0x40] sm:$0xff]  ;;  %v1930_v10 = vpack.c.bf16 %v849_v9, %v848_v8  ;;  %v853_v15 = vld [vmem:[#allocation10 + $0x168] sm:$0xff]  ;;  %v854_v17 = vld [vmem:[#allocation10 + $0x170] sm:$0xff] }
  0xa3   : > { %1847 = vmatprep.subr.bf16.mxu0 %v1846_v52  ;;  %v1898_v48 = vpack.c.bf16 %v661_v47, %v660_v46  ;;  %v855_v18 = vld [vmem:[#allocation10 + $0x178] sm:$0xff]  ;;  %v981_v21 = vld [vmem:[#allocation11 + $0xd0] sm:$0xff]  ;;  %v957_v46 = vld [vmem:[#allocation11 + $0x28] sm:$0xff] }
  0xa4   : > { %v1388_v33 = vld [vmem:[%s2678_s4] ss:$0 sm:$0xff]  ;;  %v954_v39 = vld [vmem:[#allocation11 + $0x10] sm:$0xff]  ;;  %v1145_v8 = vld [vmem:[#allocation11 + $0x128] sm:$0xff] }
  0xa5   : > { %1861 = vmatpush3.bf16.msra.mxu1 %v1858_v51  ;;  %v1902_v51 = vpack.c.bf16 %v663_v50, %v662_v49  ;;  %v955_v40 = vld [vmem:[#allocation11 + $0x18] sm:$0xff] }
  0xa6   : > { %1849 = vmatpush3.bf16.msra.mxu0 %v1846_v52  ;;  %1863 = vmatprep.subr.bf16.mxu1 %v1862_v55  ;;  %v664_v52 = vld [vmem:[#allocation10 + $0x60] sm:$0xff]  ;;  %v959_v49 = vld [vmem:[#allocation11 + $0x38] sm:$0xff] }
  0xa7   : > { %1947 = vmatprep.subr.bf16.mxu0 %v1946_v11  ;;  %v1906_v54 = vpack.c.bf16 %v665_v53, %v664_v52  ;;  %v960_v52 = vld [vmem:[#allocation11 + $0x40] sm:$0xff]  ;;  %v961_v53 = vld [vmem:[#allocation11 + $0x48] sm:$0xff] }
  0xa9   : > { %1590 = vmatmul.mubr.msk.f32.vlgmr.msra.gmra.mrb[0].mxu0 %vm341_vm0, %v540_v56  ;;  %1865 = vmatpush3.bf16.msra.mxu1 %v1862_v55  ;;  %v666_v55 = vld [vmem:[#allocation10 + $0x70] sm:$0xff]  ;;  %v667_v56 = vld [vmem:[#allocation10 + $0x78] sm:$0xff] }
  0xaa   : > { %1867 = vmatprep.subr.bf16.mxu1 %v1866_v59  ;;  %1949 = vmatpush3.bf16.msra.mxu0 %v1946_v11  ;;  %v1910_v57 = vpack.c.bf16 %v667_v56, %v666_v55  ;;  %v850_v11 = vld [vmem:[#allocation10 + $0x150] sm:$0xff]  ;;  %v963_v56 = vld [vmem:[#allocation11 + $0x58] sm:$0xff] }
  0xab   : > { %1951 = vmatprep.subr.bf16.mxu0 %v1950_v13  ;;  %v962_v55 = vld [vmem:[#allocation11 + $0x50] sm:$0xff] }
  0xad   : > { %1869 = vmatpush3.bf16.msra.mxu1 %v1866_v59  ;;  %v841_v59 = vld [vmem:[#allocation10 + $0x108] sm:$0xff] }
  0xae   : > { %1871 = vmatprep.subr.bf16.mxu1 %v1870_v62  ;;  %1953 = vmatpush3.bf16.msra.mxu0 %v1950_v13  ;;  %v1914_v60 = vpack.c.bf16 %v841_v59, %v840_v58  ;;  %v1934_v13 = vpack.c.bf16 %v851_v12, %v850_v11  ;;  %v964_v58 = vld [vmem:[#allocation11 + $0x60] sm:$0xff]  ;;  %v965_v59 = vld [vmem:[#allocation11 + $0x68] sm:$0xff]  ;;  %v1146_v11 = vld [vmem:[#allocation11 + $0x130] sm:$0xff] }
  0xaf   : > { %1955 = vmatprep.subr.bf16.mxu0 %v1954_v16  ;;  %v1147_v12 = vld [vmem:[#allocation11 + $0x138] sm:$0xff] }
  0xb1   : > { %1873 = vmatpush3.bf16.msra.mxu1 %v1870_v62  ;;  %v843_v62 = vld [vmem:[#allocation10 + $0x118] sm:$0xff] }
  0xb2   : > { %1875 = vmatprep.subr.bf16.mxu1 %v1874_v1  ;;  %1957 = vmatpush3.bf16.msra.mxu0 %v1954_v16  ;;  %v1918_v63 = vpack.c.bf16 %v843_v62, %v842_v61  ;;  %v1938_v16 = vpack.c.bf16 %v853_v15, %v852_v14  ;;  %v966_v61 = vld [vmem:[#allocation11 + $0x70] sm:$0xff]  ;;  %v967_v62 = vld [vmem:[#allocation11 + $0x78] sm:$0xff]  ;;  %v1148_v14 = vld [vmem:[#allocation11 + $0x140] sm:$0xff] }
  0xb3   : > { %1959 = vmatprep.subr.bf16.mxu0 %v1958_v19  ;;  %v1149_v15 = vld [vmem:[#allocation11 + $0x148] sm:$0xff] }
  0xb5   : > { %1877 = vmatpush3.bf16.msra.mxu1 %v1874_v1  ;;  %v844_v1 = vld [vmem:[#allocation10 + $0x120] sm:$0xff] }
  0xb6   : > { %1879 = vmatprep.subr.bf16.mxu1 %v1878_v4  ;;  %1961 = vmatpush3.bf16.msra.mxu0 %v1958_v19  ;;  %v1942_v19 = vpack.c.bf16 %v855_v18, %v854_v17  ;;  %v1150_v17 = vld [vmem:[#allocation11 + $0x150] sm:$0xff]  ;;  %v1151_v18 = vld [vmem:[#allocation11 + $0x158] sm:$0xff] }
  0xb7   : > { %1963 = vmatprep.subr.bf16.mxu0 %v1962_v22 }
  0xb9   : > { %1881 = vmatpush3.bf16.msra.mxu1 %v1878_v4  ;;  %v1922_v4 = vpack.c.bf16 %v845_v2, %v844_v1  ;;  %v1141_v1 = vld [vmem:[#allocation11 + $0x108] sm:$0xff] }
  0xba   : > { %1883 = vmatprep.subr.bf16.mxu1 %v1882_v7  ;;  %1965 = vmatpush3.bf16.msra.mxu0 %v1962_v22  ;;  %v982_v22 = vld [vmem:[#allocation11 + $0xd8] sm:$0xff] }
 0x16f   : > { %v1553_v23 = vpop.f32.mrb[0].mxu1 }
 0x170   : > { %v449_v24 = vpop.f32.mrb[1].mxu1 }
 0x17c   : > { %v1591_v25 = vpop.f32.mrb[0].mxu0 }
 0x17d   : > { %v2042_v27 = vadd.f32 %v1591_v25, %v1553_v23  ;;  %v622_v28 = vpop.f32.mrb[1].mxu0  ;;  %v1966_v23 = vpack.c.bf16 %v982_v22, %v981_v21  ;;  %v984_v25 = vld [vmem:[#allocation11 + $0xe8] sm:$0xff] }
 0x17e   : > { %v2043_v29 = vadd.f32 %v622_v28, %v449_v24  ;;  %v983_v24 = vld [vmem:[#allocation11 + $0xe0] sm:$0xff]  ;;  %v986_v28 = vld [vmem:[#allocation11 + $0xf8] sm:$0xff]  ;;  %v1153_v21 = vld [vmem:[#allocation11 + $0x168] sm:$0xff] }
 0x17f   : > { %v641_v30 = vadd.f32 %v2042_v27, %v1387_v26  ;;  %1967 = vmatprep.subr.bf16.mxu0 %v1966_v23  ;;  %v985_v27 = vld [vmem:[#allocation11 + $0xf0] sm:$0xff] }
 0x180   : > { %v640_v31 = vadd.f32 %v2043_v29, %v1387_v26  ;;  %1969 = vmatpush3.bf16.msra.mxu0 %v1966_v23  ;;  %v1970_v26 = vpack.c.bf16 %v984_v25, %v983_v24  ;;  %v1974_v29 = vpack.c.bf16 %v986_v28, %v985_v27  ;;  %v1154_v23 = vld [vmem:[#allocation11 + $0x170] sm:$0xff]  ;;  %v1155_v24 = vld [vmem:[#allocation11 + $0x178] sm:$0xff] }
 0x181   : > { %vm643_vm2 = vcmp.ge.f32.partialorder %v641_v30, 0.0  ;;  %v645_v32 = vmul.f32 0.2, %v641_v30  ;;  %v2038_v25 = vpack.c.bf16 %v1155_v24, %v1154_v23  ;;  %v1389_v27 = vld [vmem:[%s2680_s6] ss:$0 sm:$0xff] }
 0x182   : > { %vm642_vm3 = vcmp.ge.f32.partialorder %v640_v31, 0.0  ;;  %v644_v35 = vmul.f32 0.2, %v640_v31  ;;  %1971 = vmatprep.subr.bf16.mxu0 %v1970_v26 }
 0x183   : > { %v647_v36 = vsel %vm643_vm2, %v641_v30, %v645_v32  ;;  %v952_v30 = vld [vmem:[#allocation11] sm:$0xff] }
 0x184   : > { %649 = vst [vmem:[#allocation3 + $0x9] sm:$0xff] %v647_v36  ;;  %v646_v37 = vsel %vm642_vm3, %v640_v31, %v644_v35  ;;  %1973 = vmatpush3.bf16.msra.mxu0 %v1970_v26  ;;  %v953_v31 = vld [vmem:[#allocation11 + $0x8] sm:$0xff] }
 0x185   : > { %648 = vst [vmem:[#allocation3 + $0x1] sm:$0xff] %v646_v37  ;;  %1624 = vmatprep.mubr.f32.mxu1 %v646_v37  ;;  %1975 = vmatprep.subr.bf16.mxu0 %v1974_v29  ;;  %v1978_v32 = vpack.c.bf16 %v953_v31, %v952_v30 }
 0x186   : > { %1625 = vmatmul.mubr.f32.vlgmr.msra.gmra.mrb[2].mxu1 %v647_v36 }
 0x187   : > { %1885 = vmatpush3.bf16.msra.mxu1 %v1882_v7  ;;  %v1926_v7 = vpack.c.bf16 %v847_v6, %v846_v5 }
 0x188   : > { %1887 = vmatprep.subr.bf16.mxu1 %v1886_v38  ;;  %1977 = vmatpush3.bf16.msra.mxu0 %v1974_v29 }
 0x189   : > { %1979 = vmatprep.subr.bf16.mxu0 %v1978_v32 }
 0x18b   : > { %1889 = vmatpush3.bf16.msra.mxu1 %v1886_v38  ;;  %v838_v20 = vld [vmem:[#allocation3 + $0xa] sm:$0xff] }
 0x18c   : > { %v650_v44 = vld [vmem:[#allocation3] sm:$0xff]  ;;  %1891 = vmatprep.subr.bf16.mxu1 %v1890_v41  ;;  %v651_v0 = vld [vmem:[#allocation3 + $0x8] sm:$0xff] }
 0x18d   : > { %1659 = vmatprep.mubr.f32.mxu1 %v650_v44  ;;  %v837_v3 = vld [vmem:[#allocation3 + $0x2] sm:$0xff]  ;;  %v1982_v44 = vpack.c.bf16 %v955_v40, %v954_v39 }
 0x18f   : > { %1893 = vmatpush3.bf16.msra.mxu1 %v1890_v41 }
 0x190   : > { %1895 = vmatprep.subr.bf16.mxu1 %v1894_v45 }
 0x193   : > { %1897 = vmatpush3.bf16.msra.mxu1 %v1894_v45  ;;  %v956_v45 = vld [vmem:[#allocation11 + $0x20] sm:$0xff] }
 0x194   : > { %1899 = vmatprep.subr.bf16.mxu1 %v1898_v48  ;;  %v1986_v47 = vpack.c.bf16 %v957_v46, %v956_v45 }
 0x197   : > { %1901 = vmatpush3.bf16.msra.mxu1 %v1898_v48  ;;  %v958_v48 = vld [vmem:[#allocation11 + $0x30] sm:$0xff] }
 0x198   : > { %1903 = vmatprep.subr.bf16.mxu1 %v1902_v51 }
 0x19b   : > { %1905 = vmatpush3.bf16.msra.mxu1 %v1902_v51  ;;  %v1990_v51 = vpack.c.bf16 %v959_v49, %v958_v48 }
 0x19c   : > { %1907 = vmatprep.subr.bf16.mxu1 %v1906_v54 }
 0x19f   : > { %1909 = vmatpush3.bf16.msra.mxu1 %v1906_v54  ;;  %v1994_v54 = vpack.c.bf16 %v961_v53, %v960_v52 }
 0x1a0   : > { %1911 = vmatprep.subr.bf16.mxu1 %v1910_v57 }
 0x1a3   : > { %1913 = vmatpush3.bf16.msra.mxu1 %v1910_v57  ;;  %v1998_v57 = vpack.c.bf16 %v963_v56, %v962_v55 }
 0x1a4   : > { %1915 = vmatprep.subr.bf16.mxu1 %v1914_v60 }
 0x1a6   : > { %1660 = vmatmul.mubr.f32.vlgmr.msra.gmra.mrb[2].mxu1 %v651_v0  ;;  %v1140_v0 = vld [vmem:[#allocation11 + $0x100] sm:$0xff] }
 0x1a7   : > { %1917 = vmatpush3.bf16.msra.mxu1 %v1914_v60  ;;  %1694 = vmatprep.mubr.f32.mxu1 %v837_v3  ;;  %v2002_v60 = vpack.c.bf16 %v965_v59, %v964_v58  ;;  %v2010_v2 = vpack.c.bf16 %v1141_v1, %v1140_v0  ;;  %v1142_v3 = vld [vmem:[#allocation11 + $0x110] sm:$0xff] }
 0x1a8   : > { %1919 = vmatprep.subr.bf16.mxu1 %v1918_v63 }
 0x1ab   : > { %1921 = vmatpush3.bf16.msra.mxu1 %v1918_v63  ;;  %v2006_v63 = vpack.c.bf16 %v967_v62, %v966_v61 }
 0x1ac   : > { %1923 = vmatprep.subr.bf16.mxu1 %v1922_v4 }
 0x1af   : > { %1925 = vmatpush3.bf16.msra.mxu1 %v1922_v4  ;;  %v1143_v4 = vld [vmem:[#allocation11 + $0x118] sm:$0xff] }
 0x1b0   : > { %1927 = vmatprep.subr.bf16.mxu1 %v1926_v7  ;;  %v2014_v5 = vpack.c.bf16 %v1143_v4, %v1142_v3 }
 0x1b3   : > { %1929 = vmatpush3.bf16.msra.mxu1 %v1926_v7  ;;  %v1144_v7 = vld [vmem:[#allocation11 + $0x120] sm:$0xff] }
 0x1b4   : > { %1931 = vmatprep.subr.bf16.mxu1 %v1930_v10 }
 0x1b7   : > { %1933 = vmatpush3.bf16.msra.mxu1 %v1930_v10  ;;  %v2018_v10 = vpack.c.bf16 %v1145_v8, %v1144_v7 }
 0x1b8   : > { %1935 = vmatprep.subr.bf16.mxu1 %v1934_v13 }
 0x1bb   : > { %1937 = vmatpush3.bf16.msra.mxu1 %v1934_v13  ;;  %v2022_v13 = vpack.c.bf16 %v1147_v12, %v1146_v11 }
 0x1bc   : > { %1939 = vmatprep.subr.bf16.mxu1 %v1938_v16 }
 0x1bf   : > { %1941 = vmatpush3.bf16.msra.mxu1 %v1938_v16  ;;  %v2026_v16 = vpack.c.bf16 %v1149_v15, %v1148_v14 }
 0x1c0   : > { %1943 = vmatprep.subr.bf16.mxu1 %v1942_v19 }
 0x1c3   : > { %1945 = vmatpush3.bf16.msra.mxu1 %v1942_v19  ;;  %v2030_v19 = vpack.c.bf16 %v1151_v18, %v1150_v17 }
 0x1c6   : > { %1695 = vmatmul.mubr.f32.vlgmr.msra.gmra.mrb[2].mxu1 %v838_v20  ;;  %v1152_v20 = vld [vmem:[#allocation11 + $0x160] sm:$0xff] }
 0x1c7   : > { %v2034_v22 = vpack.c.bf16 %v1153_v21, %v1152_v20 }
 0x299   : > { %v1696_v34 = vpop.f32.mrb[2].mxu1 }
 0x29a   : > { %v941_v35 = vadd.f32 %v1696_v34, %v1388_v33  ;;  %v922_v36 = vpop.f32.mrb[3].mxu1 }
 0x29b   : > { %v940_v37 = vadd.f32 %v1388_v33, %v922_v36 }
 0x29c   : > { %vm943_vm4 = vcmp.ge.f32.partialorder %v941_v35, 0.0  ;;  %v945_v38 = vmul.f32 0.2, %v941_v35 }
 0x29d   : > { %vm942_vm5 = vcmp.ge.f32.partialorder %v940_v37, 0.0  ;;  %v944_v41 = vmul.f32 0.2, %v940_v37 }
 0x29e   : > { %v947_v42 = vsel %vm943_vm4, %v941_v35, %v945_v38 }
 0x29f   : > { %949 = vst [vmem:[#allocation4 + $0x9] sm:$0xff] %v947_v42  ;;  %v946_v43 = vsel %vm942_vm5, %v940_v37, %v944_v41 }
 0x2a0   : > { %948 = vst [vmem:[#allocation4 + $0x1] sm:$0xff] %v946_v43  ;;  %1729 = vmatprep.mubr.f32.mxu0 %v946_v43 }
 0x2a1   : > { %1730 = vmatmul.mubr.f32.vlgmr.msra.gmra.mrb[2].mxu0 %v947_v42 }
 0x2a2   : > { %1981 = vmatpush3.bf16.msra.mxu0 %v1978_v32 }
 0x2a3   : > { %1983 = vmatprep.subr.bf16.mxu0 %v1982_v44 }
 0x2a6   : > { %1985 = vmatpush3.bf16.msra.mxu0 %v1982_v44  ;;  %v1138_v26 = vld [vmem:[#allocation4 + $0xa] sm:$0xff] }
 0x2a7   : > { %v950_v50 = vld [vmem:[#allocation4] sm:$0xff]  ;;  %1987 = vmatprep.subr.bf16.mxu0 %v1986_v47  ;;  %v951_v6 = vld [vmem:[#allocation4 + $0x8] sm:$0xff] }
 0x2a8   : > { %1764 = vmatprep.mubr.f32.mxu0 %v950_v50  ;;  %v1137_v9 = vld [vmem:[#allocation4 + $0x2] sm:$0xff] }
 0x2aa   : > { %1989 = vmatpush3.bf16.msra.mxu0 %v1986_v47 }
 0x2ab   : > { %1991 = vmatprep.subr.bf16.mxu0 %v1990_v51 }
 0x2ae   : > { %1993 = vmatpush3.bf16.msra.mxu0 %v1990_v51 }
 0x2af   : > { %1995 = vmatprep.subr.bf16.mxu0 %v1994_v54 }
 0x2b2   : > { %1997 = vmatpush3.bf16.msra.mxu0 %v1994_v54 }
 0x2b3   : > { %1999 = vmatprep.subr.bf16.mxu0 %v1998_v57 }
 0x2b6   : > { %2001 = vmatpush3.bf16.msra.mxu0 %v1998_v57 }
 0x2b7   : > { %2003 = vmatprep.subr.bf16.mxu0 %v2002_v60 }
 0x2ba   : > { %2005 = vmatpush3.bf16.msra.mxu0 %v2002_v60 }
 0x2bb   : > { %2007 = vmatprep.subr.bf16.mxu0 %v2006_v63 }
 0x2be   : > { %2009 = vmatpush3.bf16.msra.mxu0 %v2006_v63 }
 0x2bf   : > { %2011 = vmatprep.subr.bf16.mxu0 %v2010_v2 }
 0x2c1   : > { %1765 = vmatmul.mubr.f32.vlgmr.msra.gmra.mrb[2].mxu0 %v951_v6 }
 0x2c2   : > { %2013 = vmatpush3.bf16.msra.mxu0 %v2010_v2  ;;  %1799 = vmatprep.mubr.f32.mxu0 %v1137_v9 }
 0x2c3   : > { %2015 = vmatprep.subr.bf16.mxu0 %v2014_v5 }
 0x2c6   : > { %2017 = vmatpush3.bf16.msra.mxu0 %v2014_v5 }
 0x2c7   : > { %2019 = vmatprep.subr.bf16.mxu0 %v2018_v10 }
 0x2ca   : > { %2021 = vmatpush3.bf16.msra.mxu0 %v2018_v10 }
 0x2cb   : > { %2023 = vmatprep.subr.bf16.mxu0 %v2022_v13 }
 0x2ce   : > { %2025 = vmatpush3.bf16.msra.mxu0 %v2022_v13 }
 0x2cf   : > { %2027 = vmatprep.subr.bf16.mxu0 %v2026_v16 }
 0x2d2   : > { %2029 = vmatpush3.bf16.msra.mxu0 %v2026_v16 }
 0x2d3   : > { %2031 = vmatprep.subr.bf16.mxu0 %v2030_v19 }
 0x2d6   : > { %2033 = vmatpush3.bf16.msra.mxu0 %v2030_v19 }
 0x2d7   : > { %2035 = vmatprep.subr.bf16.mxu0 %v2034_v22 }
 0x2da   : > { %2037 = vmatpush3.bf16.msra.mxu0 %v2034_v22 }
 0x2db   : > { %2039 = vmatprep.subr.bf16.mxu0 %v2038_v25 }
 0x2de   : > { %2041 = vmatpush3.bf16.msra.mxu0 %v2038_v25 }
 0x2e1   : > { %1800 = vmatmul.mubr.f32.vlgmr.msra.gmra.mrb[2].mxu0 %v1138_v26 }
 0x3b4   : > { %v1801_v28 = vpop.f32.mrb[2].mxu0 }
 0x3b5   : > { %v1241_v29 = vadd.f32 %v1801_v28, %v1389_v27  ;;  %v1222_v30 = vpop.f32.mrb[3].mxu0 }
 0x3b6   : > { %v1240_v31 = vadd.f32 %v1389_v27, %v1222_v30 }
 0x3b7   : > { %vm1243_vm6 = vcmp.ge.f32.partialorder %v1241_v29, 0.0  ;;  %v1245_v32 = vmul.f32 0.2, %v1241_v29 }
 0x3b8   : > { %vm1242_vm7 = vcmp.ge.f32.partialorder %v1240_v31, 0.0  ;;  %v1244_v33 = vmul.f32 0.2, %v1240_v31 }
 0x3b9   : > { %v1247_v34 = vsel %vm1243_vm6, %v1241_v29, %v1245_v32 }
 0x3ba   : > { %1249 = vst [vmem:[%s340_s12 + $0x8] sm:$0xff] %v1247_v34  ;;  %v1246_v35 = vsel %vm1242_vm7, %v1240_v31, %v1244_v33 }
 0x3bb   : > { %1248 = vst [vmem:[%s340_s12] sm:$0xff] %v1246_v35 }
 0x3bc   : > { %2263 = shalt.err (!%p2260_p4)
}
 0x3bd   : > { %s2264_s13 = scalar_lea.hbm %s2630_s23, 256  ;;  %s2268_s14 = scalar_lea.hbm %s2681_s7, 512 }
 0x3be   : > { %p2265_p9 = scmp.ne.s32.totalorder %s2630_s23, %s2264_s13  ;;  %p2269_p8 = scmp.lt.u32.totalorder %s2630_s23, %s2681_s7 }
 0x3bf   : > { %p2270_p13 = scmp.lt.u32.totalorder %s2268_s14, %s2264_s13  ;;  %p2272_p10 = scmp.lt.u32.totalorder %s2264_s13, %s2630_s23 }
 0x3c0   : > { %p2266_p0 = pnand %p2265_p9, %p2530_p5 }
 0x3c1   : > { %p2271_p6 = por %p2270_p13, %p2269_p8 }
 0x3c2   : > { %p2267_p11 = pneg %p2266_p0 }
 0x3c3   : > { %p2273_p3 = por %p2272_p10, %p2271_p6 }
 0x3c5   : > { %p2274_p7 = pnand %p2273_p3, %p2267_p11 }
 0x3c7   : > { %2277 = shalt.err (!%p2274_p7)
}
 0x3c8   : > { %s2334_s16 = smov 128   ;;  %s2335_s29 = smov 8  }
 0x3c9   : > { %2068 = dma.vmem_to_hbm [thread:$0]  (%p2530_p5), %s2625_s20, 256, %s2630_s23, %s1251_s28, %s2334_s16, %s2334_s16, %s2335_s29  }
 0x3ca PF: > { %s2701_s11 = sld [smem:[#allocation18_spill]]  ;;  %s1279_s8 = sand.u32 1, %s2312_s24  }
 0x3cb   : > { %p2703_p1 = scmp.ge.s32.totalorder %s2324_s27, 2  ;;  %s1280_s30 = scalar_lea.sflag [#allocation7], %s1279_s8 }
 0x3d0   : > { %p2702_p12 = scmp.ne.s32.totalorder %s2701_s11, 0 }
 0x3d2   : > { %p2085_p2 = pnand %p2703_p1, %p2702_p12 }
 0x3d4   : > { %2307 = dma.done.wait (!%p2085_p2), %s1280_s30, 256  }
 0x3d5   : > { %2309 = vsyncadd (!%p2085_p2), %s1280_s30, 4294967040  ;;  %p22_p4 = scmp.ge.s32.totalorder %s2516_s22, 4   ;;  %s2704_s24 = smov %s2316_s25 }
 0x3d6   : > { %s2705_s25 = smov %s2320_s26  ;;  %s2706_s26 = smov %s2526_s18 }
 0x3d7   : > { %s2707_s27 = smov %s2516_s22  ;;  %24 = sbr.rel (!%p22_p4) target bundleno = 7 (0x7), region = 111 }
 0x3de   :  { %1285 = vsyncpa [#allocation6], 1 }
 0x3df   :  { %1287 = vsyncpa [#allocation6 + $0x1], 1 }
 0x3e0   :  { %1288 = vsyncpa [#allocation9], 1 }
 0x3e1   :  { %1289 = vsyncpa [#allocation12], 1 }
 0x3e2   :  { %1290 = vsyncpa [#allocation7], 1 }
 0x3e3   :  { %1292 = vsyncpa [#allocation7 + $0x1], 1 }

</bundles_post_ra>
